<compile_context>
chip_gen: v7x
topology: tpu7x:2x2x1
jax: 0.10.0
libtpu: 0.0.40
codegen_flags: <defaults>
</compile_context>

<pallas_src>
import numpy as np
import jax
import jax.numpy as jnp
from jax import lax
from jax.experimental import pallas as pl
from jax.experimental.pallas import tpu as pltpu


def _round_up(x, m):
    return ((x + m - 1) // m) * m


def _make_kernel(num_fields, embed_dim):
    F, D = num_fields, embed_dim

    def kernel(idx_ref, tab_ref, out_ref):
        # idx_ref : (TB, F) int32 -- embedding row ids (field offsets pre-added)
        # tab_ref : (V, D)        -- full embedding table, VMEM-resident
        # out_ref : (TB, F*D)     -- lane-dense output slab for this batch tile
        tab = tab_ref[...]
        idx = idx_ref[...]
        tb = idx.shape[0]
        v = tab.shape[0]
        iota = lax.broadcasted_iota(jnp.int32, (tb, v), 1)
        for f in range(F):  # static, small
            onehot = (idx[:, f:f + 1] == iota).astype(tab.dtype)          # (TB, V)
            rows = jnp.dot(onehot, tab,
                           preferred_element_type=jnp.float32,
                           precision=lax.Precision.HIGHEST)               # (TB, D)
            out_ref[:, f * D:(f + 1) * D] = rows.astype(out_ref.dtype)

    return kernel


def _vmem_limit_bytes(V, D, TB, F, itemsize):
    # Generous estimate: double-buffered table + idx + output blocks, lane-padded.
    table_b = 2 * V * _round_up(D, 128) * itemsize
    idx_b = 2 * TB * 128 * 4
    out_b = 2 * TB * _round_up(F * D, 128) * itemsize
    need = table_b + idx_b + out_b + (4 << 20)
    # Stay within v7x's 64 MiB/TC budget; never below the 32 MiB scoped default.
    return int(min(max(need, 32 << 20), 40 << 20))


@jax.jit
def features_embedding(x_idx, offsets, table):
    """x_idx: (B, F) int32, offsets: (F,) int32, table: (V, D) float32
       -> (B, F, D) float32 embedding lookup with per-field offsets."""
    B, F = x_idx.shape
    V, D = table.shape

    # Fold per-field offsets once in the wrapper (trivial int32 add in XLA).
    idx = x_idx.astype(jnp.int32) + offsets[None, :].astype(jnp.int32)

    # Batch tile (multiple of 8 sublanes); pad the batch so it divides evenly.
    TB = min(256, _round_up(B, 8))
    B_pad = _round_up(B, TB)
    if B_pad != B:
        idx = jnp.pad(idx, ((0, B_pad - B), (0, 0)))  # padded rows look up row 0

    grid = (B_pad // TB,)
    kernel = _make_kernel(F, D)
    itemsize = table.dtype.itemsize

    cost = pl.CostEstimate(
        flops=int(2 * B_pad * F * V * D),
        transcendentals=0,
        bytes_accessed=int(B_pad * F * 4 + V * D * itemsize
                           + B_pad * F * D * itemsize),
    )

    out = pl.pallas_call(
        kernel,
        out_shape=jax.ShapeDtypeStruct((B_pad, F * D), table.dtype),
        grid_spec=pltpu.PrefetchScalarGridSpec(
            num_scalar_prefetch=0,
            grid=grid,
            in_specs=[
                # Indices: tiled along the batch.
                pl.BlockSpec((TB, F), lambda i: (i, 0)),
                # Table: same block every step -> fetched once, VMEM-resident.
                pl.BlockSpec((V, D), lambda i: (0, 0)),
            ],
            out_specs=pl.BlockSpec((TB, F * D), lambda i: (i, 0)),
        ),
        compiler_params=pltpu.CompilerParams(
            dimension_semantics=("parallel",),
            vmem_limit_bytes=_vmem_limit_bytes(V, D, TB, F, itemsize),
        ),
        cost_estimate=cost,
    )(idx, table)

    return out[:B].reshape(B, F, D)


def init_features_embedding(key, field_dims, embed_dim):
    """Matches the PyTorch module: one table of sum(field_dims) rows with
    xavier_uniform_ init, plus per-field cumulative offsets."""
    vocab = int(sum(field_dims))
    offsets = jnp.asarray(
        np.concatenate(([0], np.cumsum(field_dims)[:-1])), dtype=jnp.int32)
    bound = float(np.sqrt(6.0 / (vocab + embed_dim)))   # xavier_uniform_
    table = jax.random.uniform(key, (vocab, embed_dim), jnp.float32,
                               minval=-bound, maxval=bound)
    return table, offsets


def features_embedding_reference(x_idx, offsets, table):
    """Pure-JAX reference for validation."""
    return jnp.take(table, x_idx + offsets[None, :], axis=0)


if __name__ == "__main__":
    key = jax.random.PRNGKey(0)
    field_dims = (11, 7, 5, 3)      # small FM-style categorical fields
    embed_dim = 16
    batch = 8
    num_fields = len(field_dims)

    k_tab, k_x = jax.random.split(key)
    table, offsets = init_features_embedding(k_tab, field_dims, embed_dim)
    x_idx = jax.random.randint(
        k_x, (batch, num_fields), minval=0,
        maxval=jnp.asarray(field_dims, jnp.int32), dtype=jnp.int32)

    out = features_embedding(x_idx, offsets, table)
    out = jax.block_until_ready(out)

    ref = features_embedding_reference(x_idx, offsets, table)
    assert out.shape == (batch, num_fields, embed_dim), out.shape
    assert bool(jnp.allclose(out, ref, rtol=0.0, atol=1e-6)), \
        f"max err {float(jnp.max(jnp.abs(out - ref)))}"

    print("KERNEL_OK")
</pallas_src>

<mosaic_0001>
module attributes {stable_mosaic.version = 11 : i64} {
  func.func @kernel(%arg0: i32, %arg1: memref<8x4xi32, #tpu.memory_space<vmem>>, %arg2: memref<26x16xf32, #tpu.memory_space<vmem>>, %arg3: memref<8x64xf32, #tpu.memory_space<vmem>>) attributes {dimension_semantics = [#tpu.dimension_semantics<parallel>], iteration_bounds = array<i64: 1>, scalar_prefetch = 0 : i64, scratch_operands = 0 : i64, tpu.core_type = #tpu.core_type<tc>, window_params = [{transform_indices = @transform_0, window_bounds = array<i64: 8, 4>}, {pipeline_mode = #tpu.pipeline_mode<synchronous>, transform_indices = @transform_1, window_bounds = array<i64: 26, 16>}, {transform_indices = @transform_2, window_bounds = array<i64: 8, 64>}]} {
    %c0 = arith.constant 0 : index
    %c0_0 = arith.constant 0 : index
    %0 = vector.load %arg2[%c0, %c0_0] : memref<26x16xf32, #tpu.memory_space<vmem>>, vector<26x16xf32>
    %c0_1 = arith.constant 0 : index
    %c0_2 = arith.constant 0 : index
    %1 = vector.load %arg1[%c0_1, %c0_2] : memref<8x4xi32, #tpu.memory_space<vmem>>, vector<8x4xi32>
    %2 = tpu.iota {dimensions = array<i32: 1>} : vector<8x26xi32>
    %3 = vector.extract_strided_slice %1 {offsets = [0, 0], sizes = [8, 1], strides = [1, 1]} : vector<8x4xi32> to vector<8x1xi32>
    %4 = vector.broadcast %3 : vector<8x1xi32> to vector<8x26xi32>
    %5 = arith.cmpi eq, %4, %2 : vector<8x26xi32>
    %6 = arith.extui %5 : vector<8x26xi1> to vector<8x26xi32>
    %7 = arith.sitofp %6 : vector<8x26xi32> to vector<8x26xf32>
    %cst = arith.constant dense<0.000000e+00> : vector<8x16xf32>
    %8 = tpu.matmul %7, %0, %cst {dimension_numbers = #tpu.dot_dimension_numbers<[1], [0], [0], [1], [0, 0, 1, 1], [], []>, precision = #tpu.contract_precision<fp32>} : vector<8x26xf32>, vector<26x16xf32>, vector<8x16xf32> -> vector<8x16xf32>
    %c0_3 = arith.constant 0 : index
    %c0_4 = arith.constant 0 : index
    %9 = vector.load %arg3[%c0_3, %c0_4] : memref<8x64xf32, #tpu.memory_space<vmem>>, vector<8x16xf32>
    tpu.vector_store %arg3[%c0_3, %c0_4], %8 {strides = array<i32>} : memref<8x64xf32, #tpu.memory_space<vmem>>, vector<8x16xf32>,
    %10 = vector.extract_strided_slice %1 {offsets = [0, 1], sizes = [8, 1], strides = [1, 1]} : vector<8x4xi32> to vector<8x1xi32>
    %11 = vector.broadcast %10 : vector<8x1xi32> to vector<8x26xi32>
    %12 = arith.cmpi eq, %11, %2 : vector<8x26xi32>
    %13 = arith.extui %12 : vector<8x26xi1> to vector<8x26xi32>
    %14 = arith.sitofp %13 : vector<8x26xi32> to vector<8x26xf32>
    %cst_5 = arith.constant dense<0.000000e+00> : vector<8x16xf32>
    %15 = tpu.matmul %14, %0, %cst_5 {dimension_numbers = #tpu.dot_dimension_numbers<[1], [0], [0], [1], [0, 0, 1, 1], [], []>, precision = #tpu.contract_precision<fp32>} : vector<8x26xf32>, vector<26x16xf32>, vector<8x16xf32> -> vector<8x16xf32>
    %c0_6 = arith.constant 0 : index
    %c16 = arith.constant 16 : index
    %16 = vector.load %arg3[%c0_6, %c16] : memref<8x64xf32, #tpu.memory_space<vmem>>, vector<8x16xf32>
    tpu.vector_store %arg3[%c0_6, %c16], %15 {strides = array<i32>} : memref<8x64xf32, #tpu.memory_space<vmem>>, vector<8x16xf32>,
    %17 = vector.extract_strided_slice %1 {offsets = [0, 2], sizes = [8, 1], strides = [1, 1]} : vector<8x4xi32> to vector<8x1xi32>
    %18 = vector.broadcast %17 : vector<8x1xi32> to vector<8x26xi32>
    %19 = arith.cmpi eq, %18, %2 : vector<8x26xi32>
    %20 = arith.extui %19 : vector<8x26xi1> to vector<8x26xi32>
    %21 = arith.sitofp %20 : vector<8x26xi32> to vector<8x26xf32>
    %cst_7 = arith.constant dense<0.000000e+00> : vector<8x16xf32>
    %22 = tpu.matmul %21, %0, %cst_7 {dimension_numbers = #tpu.dot_dimension_numbers<[1], [0], [0], [1], [0, 0, 1, 1], [], []>, precision = #tpu.contract_precision<fp32>} : vector<8x26xf32>, vector<26x16xf32>, vector<8x16xf32> -> vector<8x16xf32>
    %c0_8 = arith.constant 0 : index
    %c32 = arith.constant 32 : index
    %23 = vector.load %arg3[%c0_8, %c32] : memref<8x64xf32, #tpu.memory_space<vmem>>, vector<8x16xf32>
    tpu.vector_store %arg3[%c0_8, %c32], %22 {strides = array<i32>} : memref<8x64xf32, #tpu.memory_space<vmem>>, vector<8x16xf32>,
    %24 = vector.extract_strided_slice %1 {offsets = [0, 3], sizes = [8, 1], strides = [1, 1]} : vector<8x4xi32> to vector<8x1xi32>
    %25 = vector.broadcast %24 : vector<8x1xi32> to vector<8x26xi32>
    %26 = arith.cmpi eq, %25, %2 : vector<8x26xi32>
    %27 = arith.extui %26 : vector<8x26xi1> to vector<8x26xi32>
    %28 = arith.sitofp %27 : vector<8x26xi32> to vector<8x26xf32>
    %cst_9 = arith.constant dense<0.000000e+00> : vector<8x16xf32>
    %29 = tpu.matmul %28, %0, %cst_9 {dimension_numbers = #tpu.dot_dimension_numbers<[1], [0], [0], [1], [0, 0, 1, 1], [], []>, precision = #tpu.contract_precision<fp32>} : vector<8x26xf32>, vector<26x16xf32>, vector<8x16xf32> -> vector<8x16xf32>
    %c0_10 = arith.constant 0 : index
    %c48 = arith.constant 48 : index
    %30 = vector.load %arg3[%c0_10, %c48] : memref<8x64xf32, #tpu.memory_space<vmem>>, vector<8x16xf32>
    tpu.vector_store %arg3[%c0_10, %c48], %29 {strides = array<i32>} : memref<8x64xf32, #tpu.memory_space<vmem>>, vector<8x16xf32>,
    return
  }
  func.func @transform_0(%arg0: i32) -> (i32, i32) {
    %c0_i32 = arith.constant 0 : i32
    %c0_i32_0 = arith.constant 0 : i32
    return %arg0, %c0_i32 : i32, i32
  }
  func.func @transform_1(%arg0: i32) -> (i32, i32) {
    %c0_i32 = arith.constant 0 : i32
    %c0_i32_0 = arith.constant 0 : i32
    %c0_i32_1 = arith.constant 0 : i32
    return %c0_i32, %c0_i32_0 : i32, i32
  }
  func.func @transform_2(%arg0: i32) -> (i32, i32) {
    %c0_i32 = arith.constant 0 : i32
    %c0_i32_0 = arith.constant 0 : i32
    return %arg0, %c0_i32 : i32, i32
  }
}

</mosaic_0001>

<bundles_post_ra>
// kernel: features_embedding.1
= control target key start
LH: loop header
LB: loop body
LE: loop exit
PB: predicated region body
PF: predicated region fallthrough
CT: control target
= control target key end

     0   :  { %v2622_v0 = vmov 0   ;;  %v2623_v2 = vmov 2   ;;  %vm28_vm0 = vcmask 1041408   ;;  %v2624_v8 = vmov 0.0|0.0   ;;  %s2629_s19 = smov 16   ;;  %s2630_s20 = smov 32   ;;  %s2894_s0 = inlined_call_operand.vmem [shape: s32[8,4], index: 0, kind: input, shape index: {}]   ;;  %s2895_s1 = inlined_call_operand.vmem [shape: f32[26,16], index: 1, kind: input, shape index: {}]   ;;  %s2896_s2 = inlined_call_operand.vmem [shape: f32[8,64], index: 2, kind: output, shape index: {}]  }
   0x1   :  { %2617 = vset.pattern.permute.xlu0 %v2622_v0  ;;  %v15_v1 = vld [vmem:[%s2894_s0] sm:$0xff]  ;;  %2619 = vset.pattern.permute.xlu1 %v2623_v2  ;;  %v12_v4 = vld [vmem:[%s2895_s1 + $0x8] sm:$0xff]  ;;  %v14_v7 = vld [vmem:[%s2895_s1 + $0x18] sm:$0x3]  ;;  %v2625_v16 = vmov 1   ;;  %v2626_v17 = vmov 3   ;;  %v16_v40 = vlaneseq }
   0x2   :  { %v11_v3 = vld [vmem:[%s2895_s1] sm:$0xff]  ;;  %19 = vperm.xlu0 %2617, %v15_v1   ;;  %1020 = vperm.xlu1 %2619, %v15_v1   ;;  %v36_v6 = vand.u32 4294901760, %v12_v4  ;;  %v13_v10 = vld [vmem:[%s2895_s1 + $0x10] sm:$0xff]  ;;  %v30_v11 = vsel %vm28_vm0, %v14_v7, 0  ;;  %vm2627_vm1 = vmmov 0   ;;  %v2628_v28 = vmov 0.0  }
   0x3   :  { %v33_v5 = vand.u32 4294901760, %v11_v3  ;;  %2423 = vmatprep.subr.bf16.mxu0 %v2624_v8  ;;  %2459 = vmatprep.subr.bf16.mxu1 %v2624_v8  ;;  %v39_v14 = vand.u32 4294901760, %v13_v10  ;;  %v42_v15 = vand.u32 4294901760, %v30_v11  ;;  %v2692_v41 = vand.u32 127, %v16_v40  ;;  %s2631_s21 = smov 48  }
   0x4   :  { %v120_v13 = vsub.f32 %v12_v4, %v36_v6  ;;  %2167 = vmatprep.mubr.msk.f32.mxu0 %vm2627_vm1, %v2628_v28  ;;  %2233 = vmatprep.mubr.msk.f32.mxu1 %vm2627_vm1, %v2628_v28  ;;  %vm24_vm2 = vcmask 211968   ;;  %vm517_vm7 = vcmask 130048   ;;  %vm1017_vm8 = vcmask 261248  }
   0x5   :  { %v2660_v9 = vpack.c.bf16 %v36_v6, %v33_v5  ;;  %v113_v12 = vsub.f32 %v11_v3, %v33_v5  ;;  %v2666_v20 = vpack.c.bf16 %v42_v15, %v39_v14  ;;  %v127_v23 = vsub.f32 %v13_v10, %v39_v14 }
   0x6   :  { %2618 = vset.pattern.permute.xlu0 %v2625_v16  ;;  %2620 = vset.pattern.permute.xlu1 %v2626_v17  ;;  %v121_v19 = vand.u32 4294901760, %v120_v13  ;;  %v134_v24 = vsub.f32 %v30_v11, %v42_v15  ;;  %vm1517_vm9 = vcmask 392448   ;;  %vm2017_vm10 = vcmask 523648  }
   0x7   :  { %v114_v18 = vand.u32 4294901760, %v113_v12  ;;  %520 = vperm.xlu0 %2618, %v15_v1   ;;  %1520 = vperm.xlu1 %2620, %v15_v1   ;;  %v128_v27 = vand.u32 4294901760, %v127_v23  ;;  %v2684_v36 = vpack.c.bf16 %v120_v13, %v113_v12 }
   0x8   :  { %2425 = vmatpush3.bf16.msra.mxu0 %v2660_v9  ;;  %2461 = vmatpush3.bf16.msra.mxu1 %v2660_v9  ;;  %v122_v22 = vsub.f32 %v120_v13, %v121_v19  ;;  %v135_v29 = vand.u32 4294901760, %v134_v24  ;;  %v2686_v37 = vpack.c.bf16 %v134_v24, %v127_v23 }
   0x9   :  { %v115_v21 = vsub.f32 %v113_v12, %v114_v18  ;;  %2426 = vmatprep.subr.bf16.mxu0 %v2624_v8  ;;  %2462 = vmatprep.subr.bf16.mxu1 %v2624_v8  ;;  %v129_v31 = vsub.f32 %v127_v23, %v128_v27  ;;  %v2688_v38 = vpack.c.bf16 %v121_v19, %v114_v18 }
   0xa   :  { %v123_v26 = vand.u32 4294901760, %v122_v22  ;;  %v136_v32 = vsub.f32 %v134_v24, %v135_v29  ;;  %v2690_v39 = vpack.c.bf16 %v135_v29, %v128_v27 }
   0xb   :  { %v116_v25 = vand.u32 4294901760, %v115_v21  ;;  %v130_v33 = vand.u32 4294901760, %v129_v31  ;;  %2621 = vset.pattern.permute.xlu0 %v2626_v17 }
   0xc   :  { %2428 = vmatpush3.bf16.msra.mxu0 %v2666_v20  ;;  %2464 = vmatpush3.bf16.msra.mxu1 %v2666_v20  ;;  %v137_v34 = vand.u32 4294901760, %v136_v32 }
   0xd   :  { %v2677_v30 = vpack.c.bf16 %v123_v26, %v116_v25  ;;  %2429 = vmatprep.subr.bf16.mxu0 %v2624_v8  ;;  %2465 = vmatprep.subr.bf16.mxu1 %v2624_v8 }
   0xe   :  { %v2682_v35 = vpack.c.bf16 %v137_v34, %v130_v33 }
  0x81   :  { %v20_v42 = vpop.permute.xlu0 %19  ;;  %v1021_v56 = vpop.permute.xlu1 %1020 }
  0x82   :  { %vm21_vm3 = vcmp.eq.s32.totalorder %v20_v42, %v2692_v41  ;;  %vm1022_vm5 = vcmp.eq.s32.totalorder %v1021_v56, %v2692_v41 }
  0x83   :  { %v2696_v43 = vsel %vm21_vm3, 1.0, %v2628_v28  ;;  %v2752_v58 = vsel %vm1022_vm5, 1.0, %v2628_v28 }
  0x84   :  { %v26_v44 = vsel %vm24_vm2, %v2696_v43, 0  ;;  %v1026_v59 = vsel %vm24_vm2, %v2752_v58, 0 }
  0x85   :  { %v102_v45 = vsub.f32 %v26_v44, %v26_v44  ;;  %v2772_v61 = vsub.f32 %v1026_v59, %v1026_v59 }
  0x86   :  { %v521_v46 = vpop.permute.xlu0 %520  ;;  %v1521_v57 = vpop.permute.xlu1 %1520 }
  0x87   :  { %vm522_vm4 = vcmp.eq.s32.totalorder %v521_v46, %v2692_v41  ;;  %v103_v47 = vand.u32 4294901760, %v102_v45  ;;  %vm1522_vm6 = vcmp.eq.s32.totalorder %v1521_v57, %v2692_v41  ;;  %v1099_v63 = vand.u32 4294901760, %v2772_v61 }
  0x88   :  { %v2702_v48 = vsel %vm522_vm4, 1.0, %v2628_v28  ;;  %v2767_v60 = vsel %vm1522_vm6, 1.0, %v2628_v28 }
  0x89   :  { %v526_v49 = vsel %vm24_vm2, %v2702_v48, 0  ;;  %v104_v50 = vsub.f32 %v102_v45, %v103_v47  ;;  %v1526_v62 = vsel %vm24_vm2, %v2767_v60, 0  ;;  %v1100_v1 = vsub.f32 %v2772_v61, %v1099_v63 }
  0x8a   :  { %v598_v51 = vsub.f32 %v526_v49, %v526_v49  ;;  %v2784_v0 = vsub.f32 %v1526_v62, %v1526_v62 }
  0x8b   :  { %v105_v52 = vand.u32 4294901760, %v104_v50  ;;  %v1101_v3 = vand.u32 4294901760, %v1100_v1 }
  0x8c   :  { %v599_v53 = vand.u32 4294901760, %v598_v51  ;;  %v1599_v2 = vand.u32 4294901760, %v2784_v0 }
  0x8d   :  { %2168 = vmatmul.mubr.f32.vlgmr.msra.gmra.mrb[0].mxu0 %v105_v52 }
  0x8e   :  { %2431 = vmatpush3.bf16.msra.mxu0 %v2677_v30  ;;  %v600_v54 = vsub.f32 %v598_v51, %v599_v53  ;;  %2178 = vmatprep.mubr.msk.f32.mxu0 %vm2627_vm1, %v2628_v28  ;;  %v1600_v4 = vsub.f32 %v2784_v0, %v1599_v2 }
  0x8f   :  { %2432 = vmatprep.subr.bf16.mxu0 %v2624_v8 }
  0x90   :  { %v601_v55 = vand.u32 4294901760, %v600_v54  ;;  %v1601_v5 = vand.u32 4294901760, %v1600_v4 }
  0x92   :  { %2434 = vmatpush3.bf16.msra.mxu0 %v2682_v35  ;;  %2234 = vmatmul.mubr.f32.vlgmr.msra.gmra.mrb[0].mxu1 %v601_v55 }
  0x93   :  { %2467 = vmatpush3.bf16.msra.mxu1 %v2677_v30  ;;  %2435 = vmatprep.subr.bf16.mxu0 %v2624_v8 }
  0x94   :  { %2468 = vmatprep.subr.bf16.mxu1 %v2624_v8  ;;  %2244 = vmatprep.mubr.msk.f32.mxu1 %vm2627_vm1, %v2628_v28 }
  0x95   :  { %2179 = vmatmul.mubr.msk.f32.vlgmr.msra.gmra.mrb[0].mxu0 %vm24_vm2, %v2696_v43 }
  0x96   :  { %2437 = vmatpush3.bf16.msra.mxu0 %v2684_v36  ;;  %2189 = vmatprep.mubr.msk.f32.mxu0 %vm2627_vm1, %v2628_v28 }
  0x97   :  { %2470 = vmatpush3.bf16.msra.mxu1 %v2682_v35  ;;  %2438 = vmatprep.subr.bf16.mxu0 %v2624_v8 }
  0x98   :  { %2471 = vmatprep.subr.bf16.mxu1 %v2624_v8 }
  0x9a   :  { %2440 = vmatpush3.bf16.msra.mxu0 %v2686_v37  ;;  %2245 = vmatmul.mubr.msk.f32.vlgmr.msra.gmra.mrb[0].mxu1 %vm24_vm2, %v2702_v48 }
  0x9b   :  { %2473 = vmatpush3.bf16.msra.mxu1 %v2684_v36  ;;  %2441 = vmatprep.subr.bf16.mxu0 %v2624_v8 }
  0x9c   :  { %2474 = vmatprep.subr.bf16.mxu1 %v2624_v8  ;;  %2255 = vmatprep.mubr.msk.f32.mxu1 %vm2627_vm1, %v2628_v28 }
  0x9d   :  { %2190 = vmatmul.mubr.f32.vlgmr.msra.gmra.mrb[0].mxu0 %v102_v45 }
  0x9e   :  { %2443 = vmatpush3.bf16.msra.mxu0 %v2660_v9  ;;  %2200 = vmatprep.mubr.msk.f32.mxu0 %vm2627_vm1, %v2628_v28 }
  0x9f   :  { %2476 = vmatpush3.bf16.msra.mxu1 %v2686_v37  ;;  %2444 = vmatprep.subr.bf16.mxu0 %v2624_v8 }
  0xa0   :  { %2477 = vmatprep.subr.bf16.mxu1 %v2624_v8 }
  0xa2   :  { %2446 = vmatpush3.bf16.msra.mxu0 %v2666_v20  ;;  %2256 = vmatmul.mubr.f32.vlgmr.msra.gmra.mrb[0].mxu1 %v598_v51 }
  0xa3   :  { %2479 = vmatpush3.bf16.msra.mxu1 %v2660_v9  ;;  %2447 = vmatprep.subr.bf16.mxu0 %v2624_v8 }
  0xa4   :  { %2480 = vmatprep.subr.bf16.mxu1 %v2624_v8  ;;  %2266 = vmatprep.mubr.msk.f32.mxu1 %vm2627_vm1, %v2628_v28 }
  0xa5   :  { %2201 = vmatmul.mubr.f32.vlgmr.msra.gmra.mrb[0].mxu0 %v103_v47 }
  0xa6   :  { %2449 = vmatpush3.bf16.msra.mxu0 %v2688_v38  ;;  %2211 = vmatprep.mubr.msk.f32.mxu0 %vm2627_vm1, %v2628_v28 }
  0xa7   :  { %2482 = vmatpush3.bf16.msra.mxu1 %v2666_v20  ;;  %2450 = vmatprep.subr.bf16.mxu0 %v2624_v8 }
  0xa8   :  { %2483 = vmatprep.subr.bf16.mxu1 %v2624_v8 }
  0xaa   :  { %2452 = vmatpush3.bf16.msra.mxu0 %v2690_v39  ;;  %2267 = vmatmul.mubr.f32.vlgmr.msra.gmra.mrb[0].mxu1 %v599_v53 }
  0xab   :  { %2485 = vmatpush3.bf16.msra.mxu1 %v2688_v38  ;;  %2453 = vmatprep.subr.bf16.mxu0 %v2624_v8 }
  0xac   :  { %2486 = vmatprep.subr.bf16.mxu1 %v2624_v8  ;;  %2277 = vmatprep.mubr.msk.f32.mxu1 %vm2627_vm1, %v2628_v28 }
  0xad   :  { %2212 = vmatmul.mubr.msk.f32.vlgmr.msra.gmra.mrb[0].mxu0 %vm24_vm2, %v2696_v43 }
  0xae   :  { %2455 = vmatpush3.bf16.msra.mxu0 %v2660_v9  ;;  %2222 = vmatprep.mubr.msk.f32.mxu0 %vm2627_vm1, %v2628_v28 }
  0xaf   :  { %2488 = vmatpush3.bf16.msra.mxu1 %v2690_v39  ;;  %2456 = vmatprep.subr.bf16.mxu0 %v2624_v8 }
  0xb0   :  { %2489 = vmatprep.subr.bf16.mxu1 %v2624_v8 }
  0xb2   :  { %2458 = vmatpush3.bf16.msra.mxu0 %v2666_v20  ;;  %2278 = vmatmul.mubr.msk.f32.vlgmr.msra.gmra.mrb[0].mxu1 %vm24_vm2, %v2702_v48 }
  0xb3   :  { %2491 = vmatpush3.bf16.msra.mxu1 %v2660_v9  ;;  %2495 = vmatprep.subr.bf16.mxu0 %v2624_v8 }
  0xb4   :  { %2492 = vmatprep.subr.bf16.mxu1 %v2624_v8  ;;  %2288 = vmatprep.mubr.msk.f32.mxu1 %vm2627_vm1, %v2628_v28 }
  0xb5   :  { %2223 = vmatmul.mubr.msk.f32.vlgmr.msra.gmra.mrb[0].mxu0 %vm24_vm2, %v2696_v43 }
  0xb6   :  { %2497 = vmatpush3.bf16.msra.mxu0 %v2660_v9  ;;  %2299 = vmatprep.mubr.msk.f32.mxu0 %vm2627_vm1, %v2628_v28 }
  0xb7   :  { %2494 = vmatpush3.bf16.msra.mxu1 %v2666_v20  ;;  %2498 = vmatprep.subr.bf16.mxu0 %v2624_v8 }
  0xb8   :  { %2531 = vmatprep.subr.bf16.mxu1 %v2624_v8 }
  0xba   :  { %2500 = vmatpush3.bf16.msra.mxu0 %v2666_v20  ;;  %2289 = vmatmul.mubr.msk.f32.vlgmr.msra.gmra.mrb[0].mxu1 %vm24_vm2, %v2702_v48 }
  0xbb   :  { %2533 = vmatpush3.bf16.msra.mxu1 %v2660_v9  ;;  %2501 = vmatprep.subr.bf16.mxu0 %v2624_v8 }
  0xbc   :  { %2534 = vmatprep.subr.bf16.mxu1 %v2624_v8  ;;  %2365 = vmatprep.mubr.msk.f32.mxu1 %vm2627_vm1, %v2628_v28 }
  0xbd   :  { %2300 = vmatmul.mubr.f32.vlgmr.msra.gmra.mrb[2].mxu0 %v1101_v3 }
  0xbe   :  { %2503 = vmatpush3.bf16.msra.mxu0 %v2677_v30  ;;  %2310 = vmatprep.mubr.msk.f32.mxu0 %vm2627_vm1, %v2628_v28 }
  0xbf   :  { %2536 = vmatpush3.bf16.msra.mxu1 %v2666_v20  ;;  %2504 = vmatprep.subr.bf16.mxu0 %v2624_v8 }
  0xc0   :  { %2537 = vmatprep.subr.bf16.mxu1 %v2624_v8 }
  0xc2   :  { %2506 = vmatpush3.bf16.msra.mxu0 %v2682_v35  ;;  %2366 = vmatmul.mubr.f32.vlgmr.msra.gmra.mrb[2].mxu1 %v1601_v5 }
  0xc3   :  { %2539 = vmatpush3.bf16.msra.mxu1 %v2677_v30  ;;  %2507 = vmatprep.subr.bf16.mxu0 %v2624_v8 }
  0xc4   :  { %2540 = vmatprep.subr.bf16.mxu1 %v2624_v8  ;;  %2376 = vmatprep.mubr.msk.f32.mxu1 %vm2627_vm1, %v2628_v28 }
  0xc5   :  { %2311 = vmatmul.mubr.msk.f32.vlgmr.msra.gmra.mrb[2].mxu0 %vm24_vm2, %v2752_v58 }
  0xc6   :  { %2509 = vmatpush3.bf16.msra.mxu0 %v2684_v36  ;;  %2321 = vmatprep.mubr.msk.f32.mxu0 %vm2627_vm1, %v2628_v28 }
  0xc7   :  { %2542 = vmatpush3.bf16.msra.mxu1 %v2682_v35  ;;  %2510 = vmatprep.subr.bf16.mxu0 %v2624_v8 }
  0xc8   :  { %2543 = vmatprep.subr.bf16.mxu1 %v2624_v8 }
  0xca   :  { %2512 = vmatpush3.bf16.msra.mxu0 %v2686_v37  ;;  %2377 = vmatmul.mubr.msk.f32.vlgmr.msra.gmra.mrb[2].mxu1 %vm24_vm2, %v2767_v60 }
  0xcb   :  { %2545 = vmatpush3.bf16.msra.mxu1 %v2684_v36  ;;  %2513 = vmatprep.subr.bf16.mxu0 %v2624_v8 }
  0xcc   :  { %2546 = vmatprep.subr.bf16.mxu1 %v2624_v8  ;;  %2387 = vmatprep.mubr.msk.f32.mxu1 %vm2627_vm1, %v2628_v28 }
  0xcd   :  { %2322 = vmatmul.mubr.f32.vlgmr.msra.gmra.mrb[2].mxu0 %v2772_v61 }
  0xce   :  { %2515 = vmatpush3.bf16.msra.mxu0 %v2660_v9  ;;  %2332 = vmatprep.mubr.msk.f32.mxu0 %vm2627_vm1, %v2628_v28 }
  0xcf   :  { %2548 = vmatpush3.bf16.msra.mxu1 %v2686_v37  ;;  %2516 = vmatprep.subr.bf16.mxu0 %v2624_v8 }
  0xd0   :  { %2549 = vmatprep.subr.bf16.mxu1 %v2624_v8 }
  0xd2   :  { %2518 = vmatpush3.bf16.msra.mxu0 %v2666_v20  ;;  %2388 = vmatmul.mubr.f32.vlgmr.msra.gmra.mrb[2].mxu1 %v2784_v0 }
  0xd3   :  { %2551 = vmatpush3.bf16.msra.mxu1 %v2660_v9  ;;  %2519 = vmatprep.subr.bf16.mxu0 %v2624_v8 }
  0xd4   :  { %2552 = vmatprep.subr.bf16.mxu1 %v2624_v8  ;;  %2398 = vmatprep.mubr.msk.f32.mxu1 %vm2627_vm1, %v2628_v28 }
  0xd5   :  { %2333 = vmatmul.mubr.f32.vlgmr.msra.gmra.mrb[2].mxu0 %v1099_v63 }
  0xd6   :  { %2521 = vmatpush3.bf16.msra.mxu0 %v2688_v38  ;;  %2343 = vmatprep.mubr.msk.f32.mxu0 %vm2627_vm1, %v2628_v28 }
  0xd7   :  { %2554 = vmatpush3.bf16.msra.mxu1 %v2666_v20  ;;  %2522 = vmatprep.subr.bf16.mxu0 %v2624_v8 }
  0xd8   :  { %2555 = vmatprep.subr.bf16.mxu1 %v2624_v8 }
  0xda   :  { %2524 = vmatpush3.bf16.msra.mxu0 %v2690_v39  ;;  %2399 = vmatmul.mubr.f32.vlgmr.msra.gmra.mrb[2].mxu1 %v1599_v2 }
  0xdb   :  { %2557 = vmatpush3.bf16.msra.mxu1 %v2688_v38  ;;  %2525 = vmatprep.subr.bf16.mxu0 %v2624_v8 }
  0xdc   :  { %2558 = vmatprep.subr.bf16.mxu1 %v2624_v8  ;;  %2409 = vmatprep.mubr.msk.f32.mxu1 %vm2627_vm1, %v2628_v28 }
  0xdd   :  { %2344 = vmatmul.mubr.msk.f32.vlgmr.msra.gmra.mrb[2].mxu0 %vm24_vm2, %v2752_v58 }
  0xde   :  { %2527 = vmatpush3.bf16.msra.mxu0 %v2660_v9  ;;  %2354 = vmatprep.mubr.msk.f32.mxu0 %vm2627_vm1, %v2628_v28 }
  0xdf   :  { %2560 = vmatpush3.bf16.msra.mxu1 %v2690_v39  ;;  %2528 = vmatprep.subr.bf16.mxu0 %v2624_v8 }
  0xe0   :  { %2561 = vmatprep.subr.bf16.mxu1 %v2624_v8 }
  0xe2   :  { %2530 = vmatpush3.bf16.msra.mxu0 %v2666_v20  ;;  %2410 = vmatmul.mubr.msk.f32.vlgmr.msra.gmra.mrb[2].mxu1 %vm24_vm2, %v2767_v60 }
  0xe3   :  { %2563 = vmatpush3.bf16.msra.mxu1 %v2660_v9  ;;  %2420 = vmatprep.mubr.msk.f32.mxu1 %vm2627_vm1, %v2628_v28 }
  0xe4   :  { %2564 = vmatprep.subr.bf16.mxu1 %v2624_v8 }
  0xe5   :  { %2355 = vmatmul.mubr.msk.f32.vlgmr.msra.gmra.mrb[2].mxu0 %vm24_vm2, %v2752_v58 }
  0xe7   :  { %2566 = vmatpush3.bf16.msra.mxu1 %v2666_v20 }
  0xea   :  { %2421 = vmatmul.mubr.msk.f32.vlgmr.msra.gmra.mrb[2].mxu1 %vm24_vm2, %v2767_v60 }
 0x188   :  { %v513_v6 = vpop.f32.mrb[0].mxu0 }
 0x189   :  { %518 = vst.msk [vmem:[%s2896_s2] sm:$0xff] %vm517_vm7, %v513_v6  ;;  %v2224_v7 = vpop.f32.mrb[1].mxu0 }
 0x18d   :  { %v1009_v9 = vpop.f32.mrb[0].mxu1 }
 0x18e   :  { %1014 = vrot.lane.b32.xlu1 %v1009_v9, %s2629_s19  ;;  %v2290_v10 = vpop.f32.mrb[1].mxu1 }
 0x1b8   :  { %v1509_v8 = vpop.f32.mrb[2].mxu0 }
 0x1b9   :  { %1514 = vrot.lane.b32.xlu0 %v1509_v8, %s2630_s20  ;;  %v2356_v11 = vpop.f32.mrb[3].mxu0 }
 0x1bd   :  { %v2009_v12 = vpop.f32.mrb[2].mxu1 }
 0x1be   :  { %2014 = vrot.lane.b32.xlu1 %v2009_v12, %s2631_s21  ;;  %v2422_v13 = vpop.f32.mrb[3].mxu1 }
 0x200   :  { %v1015_v14 = vpop.permute.xlu1 %1014 }
 0x201   :  { %1018 = vst.msk [vmem:[%s2896_s2] sm:$0xff] %vm1017_vm8, %v1015_v14 }
 0x22b   :  { %v1515_v15 = vpop.permute.xlu0 %1514 }
 0x22c   :  { %1518 = vst.msk [vmem:[%s2896_s2] sm:$0xff] %vm1517_vm9, %v1515_v15 }
 0x230   :  { %v2015_v16 = vpop.permute.xlu1 %2014 }
 0x231   :  { %2018 = vst.msk [vmem:[%s2896_s2] sm:$0xff] %vm2017_vm10, %v2015_v16 }

</bundles_post_ra>
